<compile_context>
chip_gen: v7x
topology: tpu7x:2x2x1
jax: 0.10.0
libtpu: 0.0.40
codegen_flags: <defaults>
</compile_context>

<pallas_src>
import functools

import jax
import jax.numpy as jnp
from jax.experimental import pallas as pl
from jax.experimental.pallas import tpu as pltpu


def _round_up(n, m):
    return ((n + m - 1) // m) * m


def dqn_kernel(x_ref, w1_ref, w23_ref, b_ref, o_ref):
    """Fused fc3(relu(fc2(relu(fc1(x))))).

    x_ref:   [B, K1]      f32   batch padded to a sublane multiple
    w1_ref:  [K1, R]      f32   fc1 weight, output dim zero-padded to R
    w23_ref: [R, R + A]   bf16  fc2 | fc3 weights packed along lanes
    b_ref:   [1, 2R + A]  f32   b1 | b2 | b3 packed along lanes
    o_ref:   [B, A]       f32
    """
    x = x_ref[...]                                  # [B, K1] f32
    w1 = w1_ref[...]                                # [K1, R] f32
    b, k1 = x.shape
    r = w1.shape[1]

    # Static lane-slices into the packed bias row (zero runtime cost).
    b1 = b_ref[:, :r]
    b2 = b_ref[:, r:2 * r]
    b3 = b_ref[:, 2 * r:]

    # ---- fc1: K is tiny -> VPU broadcast-FMAs, hidden under the w23 DMA.
    if k1 <= 32:
        h1 = jnp.broadcast_to(b1, (b, r))           # accumulator init = bias
        for k in range(k1):                         # statically unrolled
            h1 = h1 + x[:, k:k + 1] * w1[k:k + 1, :]
    else:
        # Guard: large input_dims would bloat the unrolled trace -> use MXU.
        h1 = jnp.dot(x, w1, preferred_element_type=jnp.float32) + b1
    h1 = jnp.maximum(h1, 0.0)                       # ReLU in f32

    # ---- fc2: the MXU-shaped matmul. bf16 inputs, f32 accumulation.
    w2 = w23_ref[:, :r]                             # [R, R] bf16 view
    h2 = jnp.dot(h1.astype(jnp.bfloat16), w2,
                 preferred_element_type=jnp.float32) + b2
    h2 = jnp.maximum(h2, 0.0)

    # ---- fc3: small output width (A lanes), masked store is fine.
    w3 = w23_ref[:, r:]                             # [R, A] bf16 view
    o_ref[...] = jnp.dot(h2.astype(jnp.bfloat16), w3,
                         preferred_element_type=jnp.float32) + b3


def prepare_params(w1, b1, w2, b2, w3, b3):
    """One-time preprocessing of PyTorch-layout params ([in, out] weights).

    Returns (w1_p f32 [K1,R], w23 bf16 [R, R+A], b_all f32 [1, 2R+A], n_actions).
    Do NOT call this per step; its casts/pads would otherwise dominate traffic.
    """
    in_dims, fc1 = w1.shape
    _, fc2 = w2.shape
    _, n_actions = w3.shape

    r = _round_up(max(fc1, fc2), 128)               # common hidden width
    a = _round_up(max(n_actions, 8), 8)             # small output pad (not 128)

    w1_p = jnp.zeros((in_dims, r), jnp.float32).at[:, :fc1].set(
        w1.astype(jnp.float32))
    w2_p = jnp.zeros((r, r), jnp.bfloat16).at[:fc1, :fc2].set(
        w2.astype(jnp.bfloat16))
    w3_p = jnp.zeros((r, a), jnp.bfloat16).at[:fc2, :n_actions].set(
        w3.astype(jnp.bfloat16))
    w23 = jnp.concatenate([w2_p, w3_p], axis=1)     # [R, R + A] bf16

    b_all = jnp.zeros((1, 2 * r + a), jnp.float32)
    b_all = b_all.at[:, :fc1].set(jnp.reshape(b1, (1, -1)).astype(jnp.float32))
    b_all = b_all.at[:, r:r + fc2].set(jnp.reshape(b2, (1, -1)).astype(jnp.float32))
    b_all = b_all.at[:, 2 * r:2 * r + n_actions].set(
        jnp.reshape(b3, (1, -1)).astype(jnp.float32))

    return w1_p, w23, b_all, n_actions


@functools.partial(jax.jit, static_argnames=("n_actions",))
def dqn_forward(state, w1_p, w23, b_all, *, n_actions):
    """state: [batch, in_dims]; params as produced by prepare_params."""
    batch, in_dims = state.shape
    r = w1_p.shape[1]
    a = w23.shape[1] - r

    b_pad = _round_up(max(batch, 8), 8)             # f32 sublane multiple
    x_p = jnp.zeros((b_pad, in_dims), jnp.float32).at[:batch].set(
        state.astype(jnp.float32))

    flops = 2 * b_pad * (in_dims * r + r * r + r * a)
    bytes_accessed = (x_p.size * 4 + w1_p.size * 4 + w23.size * 2
                      + b_all.size * 4 + b_pad * a * 4)

    vmem = pl.BlockSpec(memory_space=pltpu.VMEM)
    out_padded = pl.pallas_call(
        dqn_kernel,
        out_shape=jax.ShapeDtypeStruct((b_pad, a), jnp.float32),
        in_specs=[vmem, vmem, vmem, vmem],
        out_specs=vmem,
        cost_estimate=pl.CostEstimate(
            flops=flops, transcendentals=0, bytes_accessed=bytes_accessed),
    )(x_p, w1_p, w23, b_all)

    return out_padded[:batch, :n_actions]


def init_linear(key, fan_in, fan_out):
    # Mimic torch.nn.Linear default init: U(-1/sqrt(fan_in), 1/sqrt(fan_in)).
    kw, kb = jax.random.split(key)
    bound = 1.0 / jnp.sqrt(jnp.float32(fan_in))
    w = jax.random.uniform(kw, (fan_in, fan_out), jnp.float32, -bound, bound)
    b = jax.random.uniform(kb, (1, fan_out), jnp.float32, -bound, bound)
    return w, b


if __name__ == "__main__":
    # LunarLander-v2: input_dims = [8], fc1 = fc2 = 256, n_actions = 4.
    batch, input_dims, fc1_dims, fc2_dims, n_actions = 2, 8, 256, 256, 4

    key = jax.random.PRNGKey(0)
    k_x, k1, k2, k3 = jax.random.split(key, 4)

    state = jax.random.normal(k_x, (batch, input_dims), jnp.float32)
    w1, b1 = init_linear(k1, input_dims, fc1_dims)
    w2, b2 = init_linear(k2, fc1_dims, fc2_dims)
    w3, b3 = init_linear(k3, fc2_dims, n_actions)

    # One-time parameter prep (cast/pad/pack) -- amortized over all steps.
    w1_p, w23, b_all, na = prepare_params(w1, b1, w2, b2, w3, b3)
    w1_p, w23, b_all = jax.block_until_ready((w1_p, w23, b_all))

    actions = dqn_forward(state, w1_p, w23, b_all, n_actions=na)
    actions = jax.block_until_ready(actions)

    # Pure-JAX reference: f32 fc1, bf16-rounded fc2/fc3 weights & activations
    # with f32 accumulation (matches the kernel's numerics).
    w2r = w2.astype(jnp.bfloat16).astype(jnp.float32)
    w3r = w3.astype(jnp.bfloat16).astype(jnp.float32)
    h1 = jnp.maximum(state @ w1 + b1, 0.0)
    h2 = jnp.maximum(h1.astype(jnp.bfloat16).astype(jnp.float32) @ w2r + b2, 0.0)
    ref = h2.astype(jnp.bfloat16).astype(jnp.float32) @ w3r + b3

    assert actions.shape == (batch, n_actions)
    assert jnp.allclose(actions, ref, atol=1e-2, rtol=1e-2), (
        float(jnp.max(jnp.abs(actions - ref))))

    print("KERNEL_OK")
</pallas_src>

<mosaic_0001>
module attributes {stable_mosaic.version = 11 : i64} {
  func.func @dqn_kernel(%arg0: memref<8x8xf32, #tpu.memory_space<vmem>>, %arg1: memref<8x256xf32, #tpu.memory_space<vmem>>, %arg2: memref<256x264xbf16, #tpu.memory_space<vmem>>, %arg3: memref<1x520xf32, #tpu.memory_space<vmem>>, %arg4: memref<8x8xf32, #tpu.memory_space<vmem>>) attributes {dimension_semantics = [], scalar_prefetch = 0 : i64, scratch_operands = 0 : i64, tpu.core_type = #tpu.core_type<tc>} {
    %c0 = arith.constant 0 : index
    %c0_0 = arith.constant 0 : index
    %0 = vector.load %arg0[%c0, %c0_0] : memref<8x8xf32, #tpu.memory_space<vmem>>, vector<8x8xf32>
    %c0_1 = arith.constant 0 : index
    %c0_2 = arith.constant 0 : index
    %1 = vector.load %arg1[%c0_1, %c0_2] : memref<8x256xf32, #tpu.memory_space<vmem>>, vector<8x256xf32>
    %c0_3 = arith.constant 0 : index
    %c0_4 = arith.constant 0 : index
    %2 = vector.load %arg3[%c0_3, %c0_4] : memref<1x520xf32, #tpu.memory_space<vmem>>, vector<1x256xf32>
    %c0_5 = arith.constant 0 : index
    %c256 = arith.constant 256 : index
    %3 = vector.load %arg3[%c0_5, %c256] : memref<1x520xf32, #tpu.memory_space<vmem>>, vector<1x256xf32>
    %c0_6 = arith.constant 0 : index
    %c512 = arith.constant 512 : index
    %4 = vector.load %arg3[%c0_6, %c512] : memref<1x520xf32, #tpu.memory_space<vmem>>, vector<1x8xf32>
    %5 = vector.shape_cast %2 : vector<1x256xf32> to vector<1x256xf32>
    %6 = vector.broadcast %5 : vector<1x256xf32> to vector<8x256xf32>
    %7 = vector.extract_strided_slice %0 {offsets = [0, 0], sizes = [8, 1], strides = [1, 1]} : vector<8x8xf32> to vector<8x1xf32>
    %8 = vector.extract_strided_slice %1 {offsets = [0, 0], sizes = [1, 256], strides = [1, 1]} : vector<8x256xf32> to vector<1x256xf32>
    %9 = vector.broadcast %7 : vector<8x1xf32> to vector<8x256xf32>
    %10 = vector.broadcast %8 : vector<1x256xf32> to vector<8x256xf32>
    %11 = arith.mulf %9, %10 : vector<8x256xf32>
    %12 = arith.addf %6, %11 : vector<8x256xf32>
    %13 = vector.extract_strided_slice %0 {offsets = [0, 1], sizes = [8, 1], strides = [1, 1]} : vector<8x8xf32> to vector<8x1xf32>
    %14 = vector.extract_strided_slice %1 {offsets = [1, 0], sizes = [1, 256], strides = [1, 1]} : vector<8x256xf32> to vector<1x256xf32>
    %15 = vector.broadcast %13 : vector<8x1xf32> to vector<8x256xf32>
    %16 = vector.broadcast %14 : vector<1x256xf32> to vector<8x256xf32>
    %17 = arith.mulf %15, %16 : vector<8x256xf32>
    %18 = arith.addf %12, %17 : vector<8x256xf32>
    %19 = vector.extract_strided_slice %0 {offsets = [0, 2], sizes = [8, 1], strides = [1, 1]} : vector<8x8xf32> to vector<8x1xf32>
    %20 = vector.extract_strided_slice %1 {offsets = [2, 0], sizes = [1, 256], strides = [1, 1]} : vector<8x256xf32> to vector<1x256xf32>
    %21 = vector.broadcast %19 : vector<8x1xf32> to vector<8x256xf32>
    %22 = vector.broadcast %20 : vector<1x256xf32> to vector<8x256xf32>
    %23 = arith.mulf %21, %22 : vector<8x256xf32>
    %24 = arith.addf %18, %23 : vector<8x256xf32>
    %25 = vector.extract_strided_slice %0 {offsets = [0, 3], sizes = [8, 1], strides = [1, 1]} : vector<8x8xf32> to vector<8x1xf32>
    %26 = vector.extract_strided_slice %1 {offsets = [3, 0], sizes = [1, 256], strides = [1, 1]} : vector<8x256xf32> to vector<1x256xf32>
    %27 = vector.broadcast %25 : vector<8x1xf32> to vector<8x256xf32>
    %28 = vector.broadcast %26 : vector<1x256xf32> to vector<8x256xf32>
    %29 = arith.mulf %27, %28 : vector<8x256xf32>
    %30 = arith.addf %24, %29 : vector<8x256xf32>
    %31 = vector.extract_strided_slice %0 {offsets = [0, 4], sizes = [8, 1], strides = [1, 1]} : vector<8x8xf32> to vector<8x1xf32>
    %32 = vector.extract_strided_slice %1 {offsets = [4, 0], sizes = [1, 256], strides = [1, 1]} : vector<8x256xf32> to vector<1x256xf32>
    %33 = vector.broadcast %31 : vector<8x1xf32> to vector<8x256xf32>
    %34 = vector.broadcast %32 : vector<1x256xf32> to vector<8x256xf32>
    %35 = arith.mulf %33, %34 : vector<8x256xf32>
    %36 = arith.addf %30, %35 : vector<8x256xf32>
    %37 = vector.extract_strided_slice %0 {offsets = [0, 5], sizes = [8, 1], strides = [1, 1]} : vector<8x8xf32> to vector<8x1xf32>
    %38 = vector.extract_strided_slice %1 {offsets = [5, 0], sizes = [1, 256], strides = [1, 1]} : vector<8x256xf32> to vector<1x256xf32>
    %39 = vector.broadcast %37 : vector<8x1xf32> to vector<8x256xf32>
    %40 = vector.broadcast %38 : vector<1x256xf32> to vector<8x256xf32>
    %41 = arith.mulf %39, %40 : vector<8x256xf32>
    %42 = arith.addf %36, %41 : vector<8x256xf32>
    %43 = vector.extract_strided_slice %0 {offsets = [0, 6], sizes = [8, 1], strides = [1, 1]} : vector<8x8xf32> to vector<8x1xf32>
    %44 = vector.extract_strided_slice %1 {offsets = [6, 0], sizes = [1, 256], strides = [1, 1]} : vector<8x256xf32> to vector<1x256xf32>
    %45 = vector.broadcast %43 : vector<8x1xf32> to vector<8x256xf32>
    %46 = vector.broadcast %44 : vector<1x256xf32> to vector<8x256xf32>
    %47 = arith.mulf %45, %46 : vector<8x256xf32>
    %48 = arith.addf %42, %47 : vector<8x256xf32>
    %49 = vector.extract_strided_slice %0 {offsets = [0, 7], sizes = [8, 1], strides = [1, 1]} : vector<8x8xf32> to vector<8x1xf32>
    %50 = vector.extract_strided_slice %1 {offsets = [7, 0], sizes = [1, 256], strides = [1, 1]} : vector<8x256xf32> to vector<1x256xf32>
    %51 = vector.broadcast %49 : vector<8x1xf32> to vector<8x256xf32>
    %52 = vector.broadcast %50 : vector<1x256xf32> to vector<8x256xf32>
    %53 = arith.mulf %51, %52 : vector<8x256xf32>
    %54 = arith.addf %48, %53 : vector<8x256xf32>
    %cst = arith.constant 0.000000e+00 : f32
    %55 = vector.broadcast %cst : f32 to vector<8x256xf32>
    %56 = arith.maximumf %54, %55 : vector<8x256xf32>
    %c0_7 = arith.constant 0 : index
    %c0_8 = arith.constant 0 : index
    %57 = vector.load %arg2[%c0_7, %c0_8] : memref<256x264xbf16, #tpu.memory_space<vmem>>, vector<256x256xbf16>
    %58 = arith.truncf %56 : vector<8x256xf32> to vector<8x256xbf16>
    %cst_9 = arith.constant dense<0.000000e+00> : vector<8x256xf32>
    %59 = tpu.matmul %58, %57, %cst_9 {dimension_numbers = #tpu.dot_dimension_numbers<[1], [0], [0], [1], [0, 0, 1, 1], [], []>} : vector<8x256xbf16>, vector<256x256xbf16>, vector<8x256xf32> -> vector<8x256xf32>
    %60 = vector.broadcast %3 : vector<1x256xf32> to vector<8x256xf32>
    %61 = arith.addf %59, %60 : vector<8x256xf32>
    %cst_10 = arith.constant 0.000000e+00 : f32
    %62 = vector.broadcast %cst_10 : f32 to vector<8x256xf32>
    %63 = arith.maximumf %61, %62 : vector<8x256xf32>
    %c0_11 = arith.constant 0 : index
    %c256_12 = arith.constant 256 : index
    %64 = vector.load %arg2[%c0_11, %c256_12] : memref<256x264xbf16, #tpu.memory_space<vmem>>, vector<256x8xbf16>
    %65 = arith.truncf %63 : vector<8x256xf32> to vector<8x256xbf16>
    %cst_13 = arith.constant dense<0.000000e+00> : vector<8x8xf32>
    %66 = tpu.matmul %65, %64, %cst_13 {dimension_numbers = #tpu.dot_dimension_numbers<[1], [0], [0], [1], [0, 0, 1, 1], [], []>} : vector<8x256xbf16>, vector<256x8xbf16>, vector<8x8xf32> -> vector<8x8xf32>
    %67 = vector.broadcast %4 : vector<1x8xf32> to vector<8x8xf32>
    %68 = arith.addf %66, %67 : vector<8x8xf32>
    %c0_14 = arith.constant 0 : index
    %c0_15 = arith.constant 0 : index
    %69 = vector.load %arg4[%c0_14, %c0_15] : memref<8x8xf32, #tpu.memory_space<vmem>>, vector<8x8xf32>
    tpu.vector_store %arg4[%c0_14, %c0_15], %68 {strides = array<i32>} : memref<8x8xf32, #tpu.memory_space<vmem>>, vector<8x8xf32>,
    return
  }
}

</mosaic_0001>

<bundles_post_ra>
// kernel: dqn_forward.1
= control target key start
LH: loop header
LB: loop body
LE: loop exit
PB: predicated region body
PF: predicated region fallthrough
CT: control target
= control target key end

     0   :  { %v748_v0 = vmov 2   ;;  %v749_v1 = vmov 0   ;;  %v750_v7 = vmov 3   ;;  %v751_v8 = vmov 1   ;;  %s958_s0 = inlined_call_operand.vmem [shape: f32[8,8], index: 0, kind: input, shape index: {}]   ;;  %s959_s2 = inlined_call_operand.vmem [shape: bf16[256,264], index: 2, kind: input, shape index: {}]   ;;  %s960_s1 = inlined_call_operand.vmem [shape: f32[8,256], index: 1, kind: input, shape index: {}]   ;;  %s961_s3 = inlined_call_operand.vmem [shape: f32[1,520], index: 3, kind: input, shape index: {}]   ;;  %s962_s4 = inlined_call_operand.vmem [shape: f32[8,8], index: 4, kind: output, shape index: {}]  }
   0x1   :  { %677 = vset.pattern.permute.xlu1 %v748_v0  ;;  %675 = vset.pattern.permute.xlu0 %v749_v1  ;;  %v18_v2 = vld [vmem:[%s958_s0] sm:$0xff]  ;;  %v687_v5 = vld [vmem:[%s959_s2 + $0x1c] ss:$12 sps:$4 sm:$0xff]   ;;  %v693_v11 = vld [vmem:[%s959_s2 + $0x4c] ss:$12 sps:$4 sm:$0xff]   ;;  %v752_v12 = vmov 4   ;;  %v25_v53 = vlaneseq }
   0x2   :  { %69 = vperm.xlu1 %677, %v18_v2   ;;  %37 = vperm.xlu0 %675, %v18_v2   ;;  %v684_v3 = vld [vmem:[%s959_s2 + $0x4] ss:$12 sps:$4 sm:$0xff]   ;;  %v686_v4 = vld [vmem:[%s959_s2] ss:$12 sps:$4 sm:$0xff]   ;;  %v753_v13 = vmov 5   ;;  %v754_v16 = vmov 6  }
   0x3   :  { %371 = vmatprep.subr.bf16.mxu0 %v684_v3  ;;  %v689_v6 = vld [vmem:[%s959_s2 + $0x18] ss:$12 sps:$4 sm:$0xff]   ;;  %v690_v9 = vld [vmem:[%s959_s2 + $0x34] ss:$12 sps:$4 sm:$0xff]   ;;  %v692_v10 = vld [vmem:[%s959_s2 + $0x30] ss:$12 sps:$4 sm:$0xff]  }
   0x4   :  { %372 = vmatpush1.bf16.msra.mxu0 %v686_v4  ;;  %v695_v14 = vld [vmem:[%s959_s2 + $0x48] ss:$12 sps:$4 sm:$0xff]   ;;  %v696_v15 = vld [vmem:[%s959_s2 + $0x64] ss:$12 sps:$4 sm:$0xff]   ;;  %v698_v17 = vld [vmem:[%s959_s2 + $0x60] ss:$12 sps:$4 sm:$0xff]  }
   0x5   :  { %373 = vmatprep.subr.bf16.mxu0 %v687_v5  ;;  %v699_v18 = vld [vmem:[%s959_s2 + $0x7c] ss:$12 sps:$4 sm:$0xff]   ;;  %v755_v19 = vmov 7   ;;  %v701_v20 = vld [vmem:[%s959_s2 + $0x78] ss:$12 sps:$4 sm:$0xff]   ;;  %v26_v54 = vshrl.u32 %v25_v53, 7 }
   0x6   :  { %678 = vset.pattern.permute.xlu1 %v750_v7  ;;  %676 = vset.pattern.permute.xlu0 %v751_v8  ;;  %v702_v21 = vld [vmem:[%s959_s2 + $0x94] ss:$12 sps:$4 sm:$0xff]   ;;  %v704_v22 = vld [vmem:[%s959_s2 + $0x90] ss:$12 sps:$4 sm:$0xff]   ;;  %v705_v23 = vld [vmem:[%s959_s2 + $0xac] ss:$12 sps:$4 sm:$0xff]  }
   0x7   :  { %85 = vperm.xlu1 %678, %v18_v2   ;;  %53 = vperm.xlu0 %676, %v18_v2   ;;  %v707_v24 = vld [vmem:[%s959_s2 + $0xa8] ss:$12 sps:$4 sm:$0xff]   ;;  %v708_v25 = vld [vmem:[%s959_s2 + $0xc4] ss:$12 sps:$4 sm:$0xff]   ;;  %v734_v28 = vld [vmem:[%s959_s2 + $0xe0] ss:$12 sps:$4 sm:$0xff]  }
   0x8   :  { %374 = vmatpush1.bf16.msra.mxu0 %v689_v6  ;;  %v732_v26 = vld [vmem:[%s959_s2 + $0xc8] ss:$12 sps:$4 sm:$0xff]   ;;  %v710_v29 = vld [vmem:[%s959_s2 + $0xc0] ss:$12 sps:$4 sm:$0xff]   ;;  %v713_v32 = vld [vmem:[%s959_s2 + $0xd8] ss:$12 sps:$4 sm:$0xff]  }
   0x9   :  { %375 = vmatprep.subr.bf16.mxu0 %v690_v9  ;;  %v733_v27 = vld [vmem:[%s959_s2 + $0x8] ss:$12 sps:$4 sm:$0xff]   ;;  %645 = vmatprep.subr.bf16.mxu1 %v732_v26  ;;  %v735_v31 = vld [vmem:[%s959_s2 + $0x20] ss:$12 sps:$4 sm:$0xff]   ;;  %v736_v33 = vld [vmem:[%s959_s2 + $0xf8] ss:$12 sps:$4 sm:$0xff]  }
   0xa   :  { %v711_v30 = vld [vmem:[%s959_s2 + $0xdc] ss:$12 sps:$4 sm:$0xff]   ;;  %646 = vmatpush3.bf16.msra.mxu1 %v733_v27  ;;  %v714_v34 = vld [vmem:[%s959_s2 + $0xf4] ss:$12 sps:$4 sm:$0xff]   ;;  %v737_v35 = vld [vmem:[%s959_s2 + $0x38] ss:$12 sps:$4 sm:$0xff]  }
   0xb   :  { %679 = vset.pattern.permute.xlu1 %v752_v12  ;;  %680 = vset.pattern.permute.xlu0 %v753_v13  ;;  %v738_v36 = vld [vmem:[%s959_s2 + $0x110] ss:$12 sps:$4 sm:$0xff]   ;;  %v717_v38 = vld [vmem:[%s959_s2 + $0x10c] ss:$12 sps:$4 sm:$0xff]   ;;  %v740_v40 = vld [vmem:[%s959_s2 + $0x128] ss:$12 sps:$4 sm:$0xff]  }
   0xc   :  { %101 = vperm.xlu1 %679, %v18_v2   ;;  %117 = vperm.xlu0 %680, %v18_v2   ;;  %v716_v37 = vld [vmem:[%s959_s2 + $0xf0] ss:$12 sps:$4 sm:$0xff]   ;;  %v719_v41 = vld [vmem:[%s959_s2 + $0x108] ss:$12 sps:$4 sm:$0xff]   ;;  %v742_v44 = vld [vmem:[%s959_s2 + $0x140] ss:$12 sps:$4 sm:$0xff]  }
   0xd   :  { %376 = vmatpush1.bf16.msra.mxu0 %v692_v10  ;;  %647 = vmatprep.subr.bf16.mxu1 %v734_v28  ;;  %v739_v39 = vld [vmem:[%s959_s2 + $0x50] ss:$12 sps:$4 sm:$0xff]   ;;  %v741_v43 = vld [vmem:[%s959_s2 + $0x68] ss:$12 sps:$4 sm:$0xff]   ;;  %v722_v45 = vld [vmem:[%s959_s2 + $0x120] ss:$12 sps:$4 sm:$0xff]  }
   0xe   :  { %377 = vmatprep.subr.bf16.mxu0 %v693_v11  ;;  %648 = vmatpush3.bf16.msra.mxu1 %v735_v31  ;;  %v720_v42 = vld [vmem:[%s959_s2 + $0x124] ss:$12 sps:$4 sm:$0xff]   ;;  %v723_v46 = vld [vmem:[%s959_s2 + $0x13c] ss:$12 sps:$4 sm:$0xff]   ;;  %v743_v47 = vld [vmem:[%s959_s2 + $0x80] ss:$12 sps:$4 sm:$0xff]  }
   0xf   :  { %649 = vmatprep.subr.bf16.mxu1 %v736_v33  ;;  %v725_v48 = vld [vmem:[%s959_s2 + $0x138] ss:$12 sps:$4 sm:$0xff]   ;;  %v726_v49 = vld [vmem:[%s959_s2 + $0x154] ss:$12 sps:$4 sm:$0xff]   ;;  %v728_v50 = vld [vmem:[%s959_s2 + $0x150] ss:$12 sps:$4 sm:$0xff]  }
  0x10   :  { %681 = vset.pattern.permute.xlu1 %v754_v16  ;;  %683 = vset.pattern.permute.xlu0 %v755_v19  ;;  %v729_v51 = vld [vmem:[%s959_s2 + $0x16c] ss:$12 sps:$4 sm:$0xff]   ;;  %v731_v52 = vld [vmem:[%s959_s2 + $0x168] ss:$12 sps:$4 sm:$0xff]   ;;  %v916_v55 = vsub.s32 0, %v26_v54  ;;  %v19_v56 = vld [vmem:[%s960_s1] sm:$0xff] }
  0x11   :  { %133 = vperm.xlu1 %681, %v18_v2   ;;  %378 = vmatpush1.bf16.msra.mxu0 %v695_v14  ;;  %v20_v57 = vld [vmem:[%s960_s1 + $0x8] sm:$0xff]  ;;  %v924_v58 = vsub.s32 1, %v26_v54  ;;  %v21_v59 = vld [vmem:[%s961_s3] sm:$0x3]  ;;  %v74_v62 = vsub.s32 2, %v26_v54  ;;  %v90_v5 = vsub.s32 3, %v26_v54 }
  0x12   :  { %379 = vmatprep.subr.bf16.mxu0 %v696_v15  ;;  %650 = vmatpush3.bf16.msra.mxu1 %v737_v35  ;;  %v43_v60 = vrot.slane %v19_v56, %v916_v55  ;;  %v47_v61 = vrot.slane %v20_v57, %v916_v55  ;;  %v28_v0 = vrot.slane %v21_v59, %v916_v55  ;;  %v106_v8 = vsub.s32 4, %v26_v54 }
  0x13   :  { %651 = vmatprep.subr.bf16.mxu1 %v738_v36  ;;  %v32_v1 = vrot.slane %v21_v59, %v924_v58  ;;  %v59_v6 = vrot.slane %v19_v56, %v924_v58  ;;  %v63_v7 = vrot.slane %v20_v57, %v924_v58  ;;  %v75_v9 = vrot.slane %v19_v56, %v74_v62 }
  0x14   :  { %v79_v10 = vrot.slane %v20_v57, %v74_v62  ;;  %v122_v15 = vsub.s32 5, %v26_v54  ;;  %v91_v16 = vrot.slane %v19_v56, %v90_v5  ;;  %v138_v28 = vsub.s32 6, %v26_v54 }
  0x15   :  { %682 = vset.pattern.permute.xlu1 %v755_v19  ;;  %380 = vmatpush1.bf16.msra.mxu0 %v698_v17  ;;  %v95_v17 = vrot.slane %v20_v57, %v90_v5  ;;  %v747_v5 = vld [vmem:[%s959_s2 + $0xb0] ss:$12 sps:$4 sm:$0xff]   ;;  %vm590_vm0 = vcmask 64512  }
  0x16   :  { %149 = vperm.xlu1 %682, %v18_v2   ;;  %381 = vmatprep.subr.bf16.mxu0 %v699_v18  ;;  %v123_v26 = vrot.slane %v19_v56, %v122_v15  ;;  %v127_v27 = vrot.slane %v20_v57, %v122_v15 }
  0x17   :  { %652 = vmatpush3.bf16.msra.mxu1 %v739_v39  ;;  %v154_v39 = vsub.s32 7, %v26_v54 }
  0x18   :  { %653 = vmatprep.subr.bf16.mxu1 %v740_v40 }
  0x19   :  { %382 = vmatpush1.bf16.msra.mxu0 %v701_v20  ;;  %v107_v20 = vrot.slane %v19_v56, %v106_v8 }
  0x1a   :  { %383 = vmatprep.subr.bf16.mxu0 %v702_v21  ;;  %v111_v21 = vrot.slane %v20_v57, %v106_v8 }
  0x1b   :  { %654 = vmatpush3.bf16.msra.mxu1 %v741_v43  ;;  %v143_v43 = vrot.slane %v20_v57, %v138_v28 }
  0x1c   :  { %655 = vmatprep.subr.bf16.mxu1 %v742_v44 }
  0x1d   :  { %384 = vmatpush1.bf16.msra.mxu0 %v704_v22 }
  0x1e   :  { %385 = vmatprep.subr.bf16.mxu0 %v705_v23 }
  0x1f   :  { %656 = vmatpush3.bf16.msra.mxu1 %v743_v47  ;;  %v155_v47 = vrot.slane %v19_v56, %v154_v39 }
  0x21   :  { %386 = vmatpush1.bf16.msra.mxu0 %v707_v24 }
  0x22   :  { %387 = vmatprep.subr.bf16.mxu0 %v708_v25 }
  0x25   :  { %388 = vmatpush1.bf16.msra.mxu0 %v710_v29 }
  0x26   :  { %389 = vmatprep.subr.bf16.mxu0 %v711_v30 }
  0x29   :  { %390 = vmatpush1.bf16.msra.mxu0 %v713_v32 }
  0x2a   :  { %391 = vmatprep.subr.bf16.mxu0 %v714_v34 }
  0x2d   :  { %392 = vmatpush1.bf16.msra.mxu0 %v716_v37 }
  0x2e   :  { %393 = vmatprep.subr.bf16.mxu0 %v717_v38 }
  0x31   :  { %394 = vmatpush1.bf16.msra.mxu0 %v719_v41 }
  0x32   :  { %395 = vmatprep.subr.bf16.mxu0 %v720_v42  ;;  %v139_v42 = vrot.slane %v19_v56, %v138_v28  ;;  %v744_v56 = vld [vmem:[%s959_s2 + $0x158] ss:$12 sps:$4 sm:$0xff]  }
  0x33   :  { %657 = vmatprep.subr.bf16.mxu1 %v744_v56 }
  0x35   :  { %396 = vmatpush1.bf16.msra.mxu0 %v722_v45 }
  0x36   :  { %397 = vmatprep.subr.bf16.mxu0 %v723_v46 }
  0x39   :  { %398 = vmatpush1.bf16.msra.mxu0 %v725_v48  ;;  %v159_v48 = vrot.slane %v20_v57, %v154_v39  ;;  %v745_v57 = vld [vmem:[%s959_s2 + $0x98] ss:$12 sps:$4 sm:$0xff]  }
  0x3a   :  { %399 = vmatprep.subr.bf16.mxu0 %v726_v49  ;;  %658 = vmatpush3.bf16.msra.mxu1 %v745_v57 }
  0x3d   :  { %400 = vmatpush1.bf16.msra.mxu0 %v728_v50 }
  0x3e   :  { %401 = vmatprep.subr.bf16.mxu0 %v729_v51 }
  0x41   :  { %402 = vmatpush1.bf16.msra.mxu0 %v731_v52 }
  0x81   :  { %v70_v63 = vpop.permute.xlu1 %69  ;;  %v38_v2 = vpop.permute.xlu0 %37 }
  0x82   :  { %v48_v3 = vmul.f32 %v43_v60, %v38_v2  ;;  %v49_v4 = vmul.f32 %v47_v61, %v38_v2  ;;  %v80_v22 = vmul.f32 %v75_v9, %v70_v63  ;;  %v81_v23 = vmul.f32 %v79_v10, %v70_v63 }
  0x84   :  { %v50_v11 = vadd.f32 %v48_v3, %v28_v0  ;;  %v51_v12 = vadd.f32 %v49_v4, %v32_v1  ;;  %v746_v4 = vld [vmem:[%s959_s2 + $0x170] ss:$12 sps:$4 sm:$0xff]  }
  0x85   :  { %659 = vmatprep.subr.bf16.mxu1 %v746_v4 }
  0x86   :  { %v86_v13 = vpop.permute.xlu1 %85  ;;  %v54_v14 = vpop.permute.xlu0 %53  ;;  %660 = vmatpush3.bf16.msra.mxu1 %v747_v5 }
  0x87   :  { %v64_v18 = vmul.f32 %v59_v6, %v54_v14  ;;  %v65_v19 = vmul.f32 %v63_v7, %v54_v14  ;;  %v96_v29 = vmul.f32 %v91_v16, %v86_v13  ;;  %v97_v30 = vmul.f32 %v95_v17, %v86_v13  ;;  %v22_v6 = vld [vmem:[%s961_s3 + $0x2] sm:$0x3] }
  0x88   :  { %v204_v7 = vrot.slane %v22_v6, %v916_v55  ;;  %v208_v8 = vrot.slane %v22_v6, %v924_v58 }
  0x89   :  { %v66_v24 = vadd.f32 %v64_v18, %v50_v11  ;;  %v67_v25 = vadd.f32 %v65_v19, %v51_v12 }
  0x8b   :  { %v82_v31 = vadd.f32 %v80_v22, %v66_v24  ;;  %v83_v32 = vadd.f32 %v81_v23, %v67_v25  ;;  %v102_v33 = vpop.permute.xlu1 %101  ;;  %v118_v34 = vpop.permute.xlu0 %117 }
  0x8c   :  { %v112_v35 = vmul.f32 %v107_v20, %v102_v33  ;;  %v113_v36 = vmul.f32 %v111_v21, %v102_v33  ;;  %v128_v40 = vmul.f32 %v123_v26, %v118_v34  ;;  %v129_v41 = vmul.f32 %v127_v27, %v118_v34  ;;  %v628_v20 = vld [vmem:[%s961_s3 + $0x4] ss:$0 sm:$0xff] }
  0x8d   :  { %v98_v37 = vadd.f32 %v96_v29, %v82_v31  ;;  %v99_v38 = vadd.f32 %v97_v30, %v83_v32 }
  0x8f   :  { %v114_v44 = vadd.f32 %v112_v35, %v98_v37  ;;  %v115_v45 = vadd.f32 %v113_v36, %v99_v38 }
  0x90   :  { %v134_v46 = vpop.permute.xlu1 %133 }
  0x91   :  { %v130_v49 = vadd.f32 %v128_v40, %v114_v44  ;;  %v131_v50 = vadd.f32 %v129_v41, %v115_v45  ;;  %v144_v51 = vmul.f32 %v139_v42, %v134_v46  ;;  %v145_v52 = vmul.f32 %v143_v43, %v134_v46 }
  0x93   :  { %v146_v59 = vadd.f32 %v144_v51, %v130_v49  ;;  %v147_v62 = vadd.f32 %v145_v52, %v131_v50 }
  0x95   :  { %v150_v53 = vpop.permute.xlu1 %149 }
  0x96   :  { %v160_v60 = vmul.f32 %v155_v47, %v150_v53  ;;  %v161_v61 = vmul.f32 %v159_v48, %v150_v53 }
  0x98   :  { %v162_v63 = vadd.f32 %v160_v60, %v146_v59  ;;  %v163_v54 = vadd.f32 %v161_v61, %v147_v62 }
  0x9a   :  { %v164_v0 = vmax.f32 %v162_v63, 0.0  ;;  %v165_v1 = vmax.f32 %v163_v54, 0.0 }
  0x9c   :  { %v198_v2 = vpack.c.bf16 %v164_v0, %v164_v0  ;;  %v199_v3 = vpack.c.bf16 %v165_v1, %v165_v1 }
  0x9e   :  { %403 = vmatprep.mubr.bf16.mxu0 %v199_v3 }
  0x9f   :  { %404 = vmatmul.mubr.bf16.vlgmr.msra.gmra.mrb[0].mxu0 %v198_v2 }
 0x172   :  { %v405_v9 = vpop.f32.mrb[0].mxu0 }
 0x173   :  { %v406_v10 = vadd.f32 %v405_v9, %v204_v7  ;;  %v407_v11 = vpop.f32.mrb[1].mxu0 }
 0x174   :  { %v408_v12 = vadd.f32 %v407_v11, %v208_v8  ;;  %v409_v13 = vpop.f32.mrb[2].mxu0 }
 0x175   :  { %v412_v14 = vmax.f32 %v406_v10, 0.0  ;;  %v410_v15 = vpop.f32.mrb[3].mxu0 }
 0x176   :  { %v413_v16 = vmax.f32 %v408_v12, 0.0 }
 0x177   :  { %v446_v18 = vpack.c.bf16 %v412_v14, %v412_v14 }
 0x178   :  { %v447_v17 = vpack.c.bf16 %v413_v16, %v413_v16 }
 0x17a   :  { %582 = vmatprep.mubr.bf16.mxu1 %v447_v17 }
 0x17b   :  { %583 = vmatmul.mubr.bf16.vlgmr.msra.gmra.mrb[0].mxu1 %v446_v18 }
 0x24e   :  { %v661_v19 = vpop.f32.mrb[0].mxu1 }
 0x24f   :  { %v662_v55 = vpop.f32.mrb[1].mxu1 }
 0x250   :  { %v663_v21 = vadd.f32 %v662_v55, %v661_v19  ;;  %v664_v58 = vpop.f32.mrb[2].mxu1 }
 0x251   :  { %v665_v22 = vpop.f32.mrb[3].mxu1 }
 0x252   :  { %v585_v23 = vadd.f32 %v663_v21, %v628_v20 }
 0x254   :  { %591 = vst.msk [vmem:[%s962_s4] sm:$0xff] %vm590_vm0, %v585_v23 }

</bundles_post_ra>
